<compile_context>
chip_gen: v7x
topology: tpu7x:2x2x1
jax: 0.10.0
libtpu: 0.0.40
codegen_flags: <defaults>
</compile_context>

<pallas_src>
import functools
import math

import jax
import jax.numpy as jnp
from jax.experimental import pallas as pl
from jax.experimental.pallas import tpu as pltpu


def _xlogx(p):
    # Trace-time constant helper; guards alpha in {0, 1} edge cases.
    return 0.0 if p <= 0.0 else p * math.log(p)


def _label_smoothing_kernel(x_ref, y_ref, out_ref, *, alpha, num_classes,
                            batch_size, block_rows):
    c = num_classes
    tb = block_rows

    x = x_ref[...].astype(jnp.float32)                 # (TB, C) logits (VPU cast)
    y = y_ref[...]                                     # (TB, 1) int32 targets

    # Row max and centered logits, computed once and reused.
    m = jnp.max(x, axis=1, keepdims=True)              # (TB, 1)
    xc = x - m                                         # (TB, C)
    log_z = jnp.log(jnp.sum(jnp.exp(xc), axis=1, keepdims=True))  # = lse - m

    smooth = alpha / (c - 1)
    certainty = 1.0 - alpha
    # sum_j label*log(label): identical for every row (trace-time constant).
    const = _xlogx(certainty) + (c - 1) * _xlogx(smooth)

    # Fused weighted reduction. Since sum_j w_j == 1 exactly:
    #   sum_j w_j * logp_j = sum_j w_j * xc_j - log_z
    # TODO(synk): for small TB / huge C on v7x, a scalar-prefetch per-row
    # dynamic-column gather of x[i, y[i]] would shave the iota/compare/select.
    col = jax.lax.broadcasted_iota(jnp.int32, (tb, c), 1)
    w = jnp.where(col == y, jnp.float32(certainty), jnp.float32(smooth))
    wsum = jnp.sum(w * xc, axis=1, keepdims=True)      # (TB, 1)

    contrib = jnp.float32(const) - (wsum - log_z)      # (TB, 1)

    # Mask rows beyond the true batch size (partial last tile holds garbage;
    # masking after compute discards any NaN/Inf those rows may have produced).
    row = (jax.lax.broadcasted_iota(jnp.int32, (tb, 1), 0)
           + pl.program_id(0) * tb)
    contrib = jnp.where(row < batch_size, contrib, jnp.float32(0.0))

    # Lane-dense (1, 8, 128) write; wrapper picks [:, 0, 0].
    out_ref[...] = jnp.full(out_ref.shape, jnp.sum(contrib), dtype=jnp.float32)


def _pick_block_rows(b, c, *, target_f32_bytes=8 * 1024 * 1024, min_tiles=6):
    """Rows per tile: multiple of 8; ~target f32 working set per block; capped
    so the batch axis yields enough grid steps (feeds both v7x TensorCores on
    the "parallel" axis and gives double-buffering >= a few steps)."""
    if b <= 8:
        return b                                   # full extent (allowed by Mosaic)
    rows = max(8, (target_f32_bytes // max(1, c * 4)) // 8 * 8)
    rows_cap = max(8, ((-(-b // min_tiles)) + 7) // 8 * 8)   # ~ceil(b/min_tiles), /8 up
    rows = min(rows, rows_cap)
    rows = min(rows, (b // 8) * 8)
    return max(8, rows)


def label_smoothing_loss(x, y, alpha=0.1, block_rows=None):
    """x: (B, C) float logits; y: (B,) int class indices. Returns scalar loss."""
    b, c = x.shape
    assert c > 1, "label smoothing needs at least 2 classes (alpha/(C-1))"
    y2 = y.astype(jnp.int32).reshape(b, 1)
    itemsize = jnp.dtype(x.dtype).itemsize

    if block_rows is None:
        block_rows = _pick_block_rows(b, c)
    num_tiles = pl.cdiv(b, block_rows)

    # VMEM budget: 2x double-buffered x block + ~3 f32-sized temporaries +
    # slack; capped at 3/4 of physical VMEM (v7x-safe: never the full 64 MiB).
    block_in_bytes = block_rows * c * itemsize
    block_f32_bytes = block_rows * c * 4
    footprint = 2 * block_in_bytes + 3 * block_f32_bytes + (2 << 20)
    try:
        vmem_cap = int(pltpu.get_tpu_info().vmem_capacity_bytes)
    except Exception:
        vmem_cap = 64 * 1024 * 1024                # worst case (v7x per-TC)
    vmem_limit = int(min(vmem_cap * 3 // 4, max(32 * 1024 * 1024, footprint)))

    kernel = functools.partial(
        _label_smoothing_kernel,
        alpha=float(alpha), num_classes=c, batch_size=b, block_rows=block_rows)

    grid_spec = pltpu.PrefetchScalarGridSpec(
        num_scalar_prefetch=0,
        grid=(num_tiles,),
        in_specs=[
            pl.BlockSpec((block_rows, c), lambda i: (i, 0)),
            pl.BlockSpec((block_rows, 1), lambda i: (i, 0)),
        ],
        out_specs=pl.BlockSpec((1, 8, 128), lambda i: (i, 0, 0)),
    )

    bytes_accessed = (b * c * itemsize             # logits read
                      + b * 4                      # targets read
                      + num_tiles * 8 * 128 * 4)   # partials written

    partials = pl.pallas_call(
        kernel,
        out_shape=jax.ShapeDtypeStruct((num_tiles, 8, 128), jnp.float32),
        grid_spec=grid_spec,
        compiler_params=pltpu.CompilerParams(
            dimension_semantics=("parallel",),
            vmem_limit_bytes=vmem_limit,
        ),
        cost_estimate=pl.CostEstimate(
            flops=5 * b * c,
            transcendentals=b * c,
            bytes_accessed=bytes_accessed,
        ),
    )(x, y2)

    # Tiny final reduction + batchmean in the wrapper.
    return jnp.sum(partials[:, 0, 0]) / jnp.float32(b)


# TODO(synk): for very large vocab (C >~ 128K f32) add a second "arbitrary"
# C-tiled grid axis with online-logsumexp scratch so the (TB, C) block stays
# under v7x's 64 MiB VMEM; not needed for ImageNet-scale class counts.


def _reference_loss(x, y, alpha=0.1):
    # Pure-JAX reference mirroring torch.nn.KLDivLoss(reduction='batchmean').
    b, c = x.shape
    label = jnp.full((b, c), alpha / (c - 1), dtype=jnp.float32)
    label = label.at[jnp.arange(b), y].set(1.0 - alpha)
    logp = jax.nn.log_softmax(x.astype(jnp.float32), axis=1)
    return jnp.sum(label * (jnp.log(label) - logp)) / b


if __name__ == "__main__":
    key = jax.random.PRNGKey(0)
    k1, k2, k3, k4 = jax.random.split(key, 4)

    # Test 1: small shape, single tile.
    B1, C1 = 8, 16
    x1 = jax.random.normal(k1, (B1, C1), dtype=jnp.float32)
    y1 = jax.random.randint(k2, (B1,), 0, C1, dtype=jnp.int32)
    loss1 = jax.block_until_ready(label_smoothing_loss(x1, y1, alpha=0.1))
    ref1 = _reference_loss(x1, y1, alpha=0.1)
    assert jnp.allclose(loss1, ref1, atol=1e-5, rtol=1e-5), (loss1, ref1)

    # Test 2: multiple tiles with a partial last tile (masking / parallel grid).
    B2, C2 = 20, 384
    x2 = jax.random.normal(k3, (B2, C2), dtype=jnp.float32)
    y2 = jax.random.randint(k4, (B2,), 0, C2, dtype=jnp.int32)
    loss2 = jax.block_until_ready(
        label_smoothing_loss(x2, y2, alpha=0.1, block_rows=8))
    ref2 = _reference_loss(x2, y2, alpha=0.1)
    assert jnp.allclose(loss2, ref2, atol=1e-5, rtol=1e-5), (loss2, ref2)

    print("KERNEL_OK")
</pallas_src>

<mosaic_0001>
module attributes {stable_mosaic.version = 11 : i64} {
  func.func @_label_smoothing_kernel(%arg0: i32, %arg1: memref<8x16xf32, #tpu.memory_space<vmem>>, %arg2: memref<8x1xi32, #tpu.memory_space<vmem>>, %arg3: memref<1x8x128xf32, #tpu.memory_space<vmem>>) attributes {dimension_semantics = [#tpu.dimension_semantics<parallel>], iteration_bounds = array<i64: 1>, scalar_prefetch = 0 : i64, scratch_operands = 0 : i64, tpu.core_type = #tpu.core_type<tc>, window_params = [{transform_indices = @transform_0, window_bounds = array<i64: 8, 16>}, {transform_indices = @transform_1, window_bounds = array<i64: 8, 1>}, {transform_indices = @transform_2, window_bounds = array<i64: 1, 8, 128>}]} {
    %c0 = arith.constant 0 : index
    %c0_0 = arith.constant 0 : index
    %0 = vector.load %arg1[%c0, %c0_0] : memref<8x16xf32, #tpu.memory_space<vmem>>, vector<8x16xf32>
    %c0_1 = arith.constant 0 : index
    %c0_2 = arith.constant 0 : index
    %1 = vector.load %arg2[%c0_1, %c0_2] : memref<8x1xi32, #tpu.memory_space<vmem>>, vector<8x1xi32>
    %cst = arith.constant dense<0xFF800000> : vector<8xf32>
    %2 = vector.multi_reduction <maximumf>, %0, %cst [1] : vector<8x16xf32> to vector<8xf32>
    %3 = vector.shape_cast %2 : vector<8xf32> to vector<8x1xf32>
    %4 = vector.broadcast %3 : vector<8x1xf32> to vector<8x16xf32>
    %5 = arith.subf %0, %4 : vector<8x16xf32>
    %6 = math.exp %5 : vector<8x16xf32>
    %cst_3 = arith.constant dense<0.000000e+00> : vector<8xf32>
    %7 = vector.multi_reduction <add>, %6, %cst_3 [1] : vector<8x16xf32> to vector<8xf32>
    %8 = vector.shape_cast %7 : vector<8xf32> to vector<8x1xf32>
    %9 = math.log %8 : vector<8x1xf32>
    %10 = tpu.iota {dimensions = array<i32: 1>} : vector<8x16xi32>
    %11 = vector.broadcast %1 : vector<8x1xi32> to vector<8x16xi32>
    %12 = arith.cmpi eq, %10, %11 : vector<8x16xi32>
    %cst_4 = arith.constant 0.899999976 : f32
    %cst_5 = arith.constant 0.00666666683 : f32
    %13 = vector.broadcast %cst_4 : f32 to vector<8x16xf32>
    %14 = vector.broadcast %cst_5 : f32 to vector<8x16xf32>
    %15 = arith.select %12, %13, %14 : vector<8x16xi1>, vector<8x16xf32>
    %16 = arith.mulf %15, %5 : vector<8x16xf32>
    %cst_6 = arith.constant dense<0.000000e+00> : vector<8xf32>
    %17 = vector.multi_reduction <add>, %16, %cst_6 [1] : vector<8x16xf32> to vector<8xf32>
    %18 = vector.shape_cast %17 : vector<8xf32> to vector<8x1xf32>
    %19 = arith.subf %18, %9 : vector<8x1xf32>
    %cst_7 = arith.constant -5.958880e-01 : f32
    %20 = vector.broadcast %cst_7 : f32 to vector<8x1xf32>
    %21 = arith.subf %20, %19 : vector<8x1xf32>
    %22 = tpu.iota {dimensions = array<i32: 0>} : vector<8x1xi32>
    %c8_i32 = arith.constant 8 : i32
    %23 = arith.muli %arg0, %c8_i32 : i32
    %24 = vector.broadcast %23 : i32 to vector<8x1xi32>
    %25 = arith.addi %22, %24 : vector<8x1xi32>
    %c8_i32_8 = arith.constant 8 : i32
    %26 = vector.broadcast %c8_i32_8 : i32 to vector<8x1xi32>
    %27 = arith.cmpi slt, %25, %26 : vector<8x1xi32>
    %cst_9 = arith.constant 0.000000e+00 : f32
    %28 = vector.broadcast %cst_9 : f32 to vector<8x1xf32>
    %29 = arith.select %27, %21, %28 : vector<8x1xi1>, vector<8x1xf32>
    %30 = vector.shape_cast %29 : vector<8x1xf32> to vector<1x8x1xf32>
    %cst_10 = arith.constant dense<0.000000e+00> : vector<1xf32>
    %31 = vector.multi_reduction <add>, %30, %cst_10 [1, 2] : vector<1x8x1xf32> to vector<1xf32>
    %32 = vector.shape_cast %31 : vector<1xf32> to vector<1x1x1xf32>
    %33 = vector.extract %32[0, 0, 0] : f32 from vector<1x1x1xf32>
    %34 = vector.broadcast %33 : f32 to vector<1x8x128xf32>
    %c0_11 = arith.constant 0 : index
    %c0_12 = arith.constant 0 : index
    %c0_13 = arith.constant 0 : index
    %35 = vector.load %arg3[%c0_11, %c0_12, %c0_13] : memref<1x8x128xf32, #tpu.memory_space<vmem>>, vector<1x8x128xf32>
    tpu.vector_store %arg3[%c0_11, %c0_12, %c0_13], %34 {strides = array<i32>} : memref<1x8x128xf32, #tpu.memory_space<vmem>>, vector<1x8x128xf32>,
    return
  }
  func.func @transform_0(%arg0: i32) -> (i32, i32) {
    %c0_i32 = arith.constant 0 : i32
    %c0_i32_0 = arith.constant 0 : i32
    return %arg0, %c0_i32 : i32, i32
  }
  func.func @transform_1(%arg0: i32) -> (i32, i32) {
    %c0_i32 = arith.constant 0 : i32
    %c0_i32_0 = arith.constant 0 : i32
    return %arg0, %c0_i32 : i32, i32
  }
  func.func @transform_2(%arg0: i32) -> (i32, i32, i32) {
    %c0_i32 = arith.constant 0 : i32
    %c0_i32_0 = arith.constant 0 : i32
    %c0_i32_1 = arith.constant 0 : i32
    return %arg0, %c0_i32, %c0_i32_0 : i32, i32, i32
  }
}

</mosaic_0001>

<bundles_post_ra>
// kernel: tpu_custom_call.1
= control target key start
LH: loop header
LB: loop body
LE: loop exit
PB: predicated region body
PF: predicated region fallthrough
CT: control target
= control target key end

     0   :  { %vm14_vm0 = vcmask 130048   ;;  %s146_s0 = inlined_call_operand.vmem [shape: f32[8,16], index: 0, kind: input, shape index: {}]   ;;  %s147_s1 = inlined_call_operand.vmem [shape: s32[8,1], index: 1, kind: input, shape index: {}]   ;;  %s148_s2 = inlined_call_operand.hbm [shape: f32[1,8,128], index: 2, kind: output, shape index: {}]  }
   0x1   :  { %v12_v0 = vld [vmem:[%s146_s0] sm:$0xff] }
   0x2   :  { %7 = vsyncpa [#allocation3], 0  ;;  %v15_v1 = vsel %vm14_vm0, %v12_v0, -inf  ;;  %v107_v2 = vmov 0   ;;  %v13_v3 = vld [vmem:[%s147_s1] sm:$0xff]  ;;  %v26_v6 = vlaneseq  ;;  %vm46_vm2 = vcmask 7168  }
   0x3   :  { %78 = vset.pattern.permute.xlu0 %v107_v2  ;;  %v108_v10 = vmov 0.006666667   ;;  %s109_s0 = smov [#allocation2]  }
   0x4   :  { %16 = vmax.xlane.f32.xlu0 %v15_v1  ;;  %v27_v8 = vand.u32 127, %v26_v6  ;;  %s65_s1 = sshll.u32 %s109_s0, 4  ;;  %s66_s1 = int_to_ptr.vmem [resolvable:$true] %s65_s1 }
   0x5   :  { %s83_s14 = scalar_lea.vmem %s66_s1, 128  ;;  %p88_p1 = scmp.lt.s32.totalorder %s66_s1, %s66_s1 }
   0x6   :  { %p84_p0 = scmp.ne.s32.totalorder %s66_s1, %s83_s14  ;;  %p89_p2 = scmp.lt.s32.totalorder %s83_s14, %s83_s14 }
   0x8   :  { %p90_p3 = por %p89_p2, %p88_p1 }
   0xa   :  { %p91_p4 = pnand %p90_p3, %p84_p0 }
  0x1a   :  { %29 = vperm.xlu0 %78, %v13_v3  }
  0x91   :  { %v17_v4 = vpop.xlane.xlu0 %16 }
  0x92   :  { %v18_v5 = vsub.f32 %v12_v0, %v17_v4 }
  0x94   :  { %v19_v7 = vmul.f32 1.442695, %v18_v5 }
  0x96   :  { %79 = vpow2.f32 %v19_v7 }
  0x99   :  { %v30_v9 = vpop.permute.xlu0 %29 }
  0x9a   :  { %vm31_vm1 = vcmp.eq.s32.totalorder %v27_v8, %v30_v9 }
  0x9b   :  { %v32_v11 = vsel %vm31_vm1, 0.9, %v108_v10 }
  0x9c   :  { %v33_v14 = vmul.f32 %v32_v11, %v18_v5 }
  0x9e   :  { %v34_v15 = vsel %vm14_vm0, %v33_v14, 0.0 }
  0xa0   :  { %v80_v12 = vpop.eup %79 }
  0xa1   :  { %v21_v13 = vsel %vm14_vm0, %v80_v12, 0.0 }
  0xa2   :  { %22 = vadd.xlane.f32.xlu1 %v21_v13 }
  0xa6   :  { %35 = vadd.xlane.f32.xlu1 %v34_v15 }
 0x12f   :  { %v23_v16 = vpop.xlane.xlu1 %22 }
 0x130   :  { %81 = vlog2.f32 %v23_v16 }
 0x133   :  { %v36_v19 = vpop.xlane.xlu1 %35 }
 0x13a   :  { %v82_v17 = vpop.eup %81 }
 0x13b   :  { %v25_v18 = vmul.f32 0.6931472, %v82_v17 }
 0x13d   :  { %v37_v20 = vsub.f32 %v36_v19, %v25_v18 }
 0x13f   :  { %v38_v21 = vsub.f32 -0.595888, %v37_v20 }
 0x141   :  { %v47_v22 = vsel %vm46_vm2, %v38_v21, 0.0 }
 0x142   :  { %48 = vadd.xlane.f32.xlu1 %v47_v22 }
 0x1cf   :  { %v49_v23 = vpop.xlane.xlu1 %48 }
 0x1d0   :  { %v50_v24 = vrot.slane %v49_v23, 4 }
 0x1d2   :  { %v51_v25 = vadd.f32 %v50_v24, %v49_v23 }
 0x1d4   :  { %v52_v26 = vrot.slane %v51_v25, 2 }
 0x1d6   :  { %v53_v27 = vadd.f32 %v52_v26, %v51_v25 }
 0x1d8   :  { %v54_v28 = vrot.slane %v53_v27, 1 }
 0x1da   :  { %v55_v29 = vadd.f32 %v54_v28, %v53_v27 }
 0x1dc   :  { %73 = vpush %v55_v29 }
 0x20d   :  { %s74_s13 = spop %73 }
 0x20e   :  { %v57_v30 = vstv %s74_s13 }
 0x20f   :  { %58 = vst [vmem:[#allocation2] sm:$0xff] %v57_v30 }
 0x210   :  { %94 = shalt.err (!%p91_p4)
}
 0x211   :  { %s95_s17 = scalar_lea.hbm %s148_s2, 128 }
 0x212   :  { %p96_p5 = scmp.ne.s32.totalorder %s148_s2, %s95_s17  ;;  %p99_p6 = scmp.lt.u32.totalorder %s95_s17, %s148_s2 }
 0x214   :  { %p101_p7 = pnand %p99_p6, %p96_p5 }
 0x216   :  { %104 = shalt.err (!%p101_p7)
}
 0x217   :  { %68 = dma.vmem_to_hbm [thread:$0]  %s66_s1, 128, %s148_s2, [#allocation3]  }
 0x218   :  { %105 = dma.done.wait [#allocation3], 128  }
 0x219   :  { %106 = vsyncadd [#allocation3], 4294967168 }
 0x21a   :  { %72 = vsyncpa [#allocation3], 1 }

</bundles_post_ra>
